<compile_context>
chip_gen: v6e
topology: v6e:2x2x1
jax: 0.10.0
libtpu: 0.0.40
codegen_flags: <defaults>
</compile_context>

<pallas_src>
import jax
import jax.numpy as jnp
from jax.experimental import pallas as pl
from jax.experimental.pallas import tpu as pltpu


def _round_up(a: int, b: int) -> int:
    return (a + b - 1) // b * b


def _choose_row_tile(n: int) -> int:
    """Row-tile (tm) heuristic.

    - n <= 256: one small 8-aligned tile (splitting is pure per-step overhead).
    - otherwise: 256-aligned tiles (full MXU systolic passes), capped at 1024
      (~12 MiB VMEM/step at d_model=256/d_ff=1024), and sized so the grid has
      >= 2 steps -> v7x megacore can shard the "parallel" axis across both TCs.
    """
    cap = 1024
    if n <= 256:
        return max(8, _round_up(n, 8))
    return min(cap, _round_up(pl.cdiv(n, 2), 256))


def _ffn_kernel(x_ref, w1_ref, b1_ref, w2_ref, b2_ref, o_ref):
    # x_ref : (tm, d_model)   native activation dtype (f32 here)
    # w1_ref: (d_model, d_ff) bf16     b1_ref: (1, d_ff)    f32
    # w2_ref: (d_ff, d_model) bf16     b2_ref: (1, d_model) f32
    # o_ref : (tm, d_model)   output dtype
    x = x_ref[...].astype(jnp.bfloat16)            # VPU cast, hidden under MXU
    h = jnp.dot(x, w1_ref[...], preferred_element_type=jnp.float32)
    h = jnp.maximum(h + b1_ref[...], 0.0)          # bias + ReLU in f32
    y = jnp.dot(h.astype(w2_ref.dtype), w2_ref[...],
                preferred_element_type=jnp.float32)
    o_ref[...] = (y + b2_ref[...]).astype(o_ref.dtype)
    # TODO(synk): training-mode dropout would mask `y` here via
    # pltpu.prng_seed + pltpu.prng_random_bits; eval mode = identity.


def positionwise_feed_forward(x, w1, b1, w2, b2, *, tm=None, out_dtype=None):
    """x: [..., d_model]; w1: [d_model, d_ff]; w2: [d_ff, d_model].

    Weights should ideally already be bf16 (cast once at init); f32 weights are
    cast here as a fallback.  out_dtype defaults to x.dtype (pass jnp.bfloat16
    if the downstream consumer accepts bf16 activations to halve writeback).
    """
    orig_shape = x.shape
    out_dtype = x.dtype if out_dtype is None else out_dtype
    d_model, d_ff = w1.shape
    x2 = x.reshape(-1, d_model)          # free row-major view, no HBM copy
    n = x2.shape[0]

    if tm is None:
        tm = _choose_row_tile(n)
    grid = pl.cdiv(n, tm)                # ragged last tile handled by Pallas

    # Weight casts: hoist to init where possible; fallback cast here.
    if w1.dtype != jnp.bfloat16:
        w1 = w1.astype(jnp.bfloat16)
    if w2.dtype != jnp.bfloat16:
        w2 = w2.astype(jnp.bfloat16)
    b1_2d = b1.reshape(1, d_ff).astype(jnp.float32)
    b2_2d = b2.reshape(1, d_model).astype(jnp.float32)

    out_itemsize = jnp.dtype(out_dtype).itemsize
    cost = pl.CostEstimate(
        flops=4 * n * d_model * d_ff,                 # two matmuls
        transcendentals=0,
        bytes_accessed=(
            x2.size * x2.dtype.itemsize               # x in, native dtype
            + n * d_model * out_itemsize              # y out
            + w1.size * 2 + w2.size * 2               # bf16 weights, read once
            + b1_2d.size * 4 + b2_2d.size * 4),
    )

    out = pl.pallas_call(
        _ffn_kernel,
        out_shape=jax.ShapeDtypeStruct((n, d_model), out_dtype),
        grid_spec=pltpu.PrefetchScalarGridSpec(
            num_scalar_prefetch=0,
            grid=(grid,),
            in_specs=[
                pl.BlockSpec((tm, d_model), lambda i: (i, 0)),
                # TODO(synk): pipeline_mode=pl.Buffered(1) on the four
                # constant-index weight/bias specs would drop their dead second
                # pipeline buffer (~1 MiB here; matters on v7x at larger
                # d_model*d_ff); omitted to keep lowering maximally portable.
                pl.BlockSpec((d_model, d_ff), lambda i: (0, 0)),
                pl.BlockSpec((1, d_ff), lambda i: (0, 0)),
                pl.BlockSpec((d_ff, d_model), lambda i: (0, 0)),
                pl.BlockSpec((1, d_model), lambda i: (0, 0)),
            ],
            out_specs=pl.BlockSpec((tm, d_model), lambda i: (i, 0)),
        ),
        compiler_params=pltpu.CompilerParams(
            dimension_semantics=("parallel",),
            vmem_limit_bytes=32 * 1024 * 1024,   # actual use ~12 MiB at tm=1024
        ),
        cost_estimate=cost,
    )(x2, w1, b1_2d, w2, b2_2d)

    return out.reshape(orig_shape)


def _reference(x, w1, b1, w2, b2):
    h = jnp.maximum(x @ w1 + b1, 0.0)
    return h @ w2 + b2


if __name__ == "__main__":
    d_model, d_ff = 256, 1024

    key = jax.random.PRNGKey(0)
    kx, k1, k2, k3, k4, kx2 = jax.random.split(key, 6)

    # Deterministic params matching nn.Linear's uniform(-1/sqrt(fan_in), +).
    lim1 = 1.0 / (d_model ** 0.5)
    lim2 = 1.0 / (d_ff ** 0.5)
    w1 = jax.random.uniform(k1, (d_model, d_ff), jnp.float32, -lim1, lim1)
    b1 = jax.random.uniform(k2, (d_ff,), jnp.float32, -lim1, lim1)
    w2 = jax.random.uniform(k3, (d_ff, d_model), jnp.float32, -lim2, lim2)
    b2 = jax.random.uniform(k4, (d_model,), jnp.float32, -lim2, lim2)

    # Hoisted "init-time" weight cast (not repeated per call).
    w1_bf16 = w1.astype(jnp.bfloat16)
    w2_bf16 = w2.astype(jnp.bfloat16)

    # Case 1: small shape consistent with the module (batch=2, seq=8).
    batch, seq = 2, 8
    x = jax.random.normal(kx, (batch, seq, d_model), jnp.float32)
    y = jax.block_until_ready(positionwise_feed_forward(x, w1_bf16, b1, w2_bf16, b2))
    y_ref = _reference(x.reshape(-1, d_model), w1, b1, w2, b2).reshape(x.shape)
    assert y.shape == x.shape and y.dtype == x.dtype
    # bf16 MXU inputs / weights -> loosened tolerance vs f32 reference.
    assert jnp.allclose(y, y_ref, atol=2e-2, rtol=2e-2), "mismatch vs reference (case 1)"

    # Case 2: row count not divisible by the tile -> exercises the ragged last
    # tile (no padding) and a 2-step parallel grid (n = 615, tm = 512).
    batch2, seq2 = 5, 123
    x2 = jax.random.normal(kx2, (batch2, seq2, d_model), jnp.float32)
    y2 = jax.block_until_ready(positionwise_feed_forward(x2, w1_bf16, b1, w2_bf16, b2))
    y2_ref = _reference(x2.reshape(-1, d_model), w1, b1, w2, b2).reshape(x2.shape)
    assert y2.shape == x2.shape
    assert jnp.allclose(y2, y2_ref, atol=2e-2, rtol=2e-2), "mismatch vs reference (case 2)"

    print("KERNEL_OK")
</pallas_src>

<mosaic_0001>
module attributes {stable_mosaic.version = 11 : i64} {
  func.func @_ffn_kernel(%arg0: i32, %arg1: memref<16x256xf32, #tpu.memory_space<vmem>>, %arg2: memref<256x1024xbf16, #tpu.memory_space<vmem>>, %arg3: memref<1x1024xf32, #tpu.memory_space<vmem>>, %arg4: memref<1024x256xbf16, #tpu.memory_space<vmem>>, %arg5: memref<1x256xf32, #tpu.memory_space<vmem>>, %arg6: memref<16x256xf32, #tpu.memory_space<vmem>>) attributes {dimension_semantics = [#tpu.dimension_semantics<parallel>], iteration_bounds = array<i64: 1>, scalar_prefetch = 0 : i64, scratch_operands = 0 : i64, tpu.core_type = #tpu.core_type<tc>, window_params = [{transform_indices = @transform_0, window_bounds = array<i64: 16, 256>}, {pipeline_mode = #tpu.pipeline_mode<synchronous>, transform_indices = @transform_1, window_bounds = array<i64: 256, 1024>}, {pipeline_mode = #tpu.pipeline_mode<synchronous>, transform_indices = @transform_2, window_bounds = array<i64: 1, 1024>}, {pipeline_mode = #tpu.pipeline_mode<synchronous>, transform_indices = @transform_3, window_bounds = array<i64: 1024, 256>}, {pipeline_mode = #tpu.pipeline_mode<synchronous>, transform_indices = @transform_4, window_bounds = array<i64: 1, 256>}, {transform_indices = @transform_5, window_bounds = array<i64: 16, 256>}]} {
    %c0 = arith.constant 0 : index
    %c0_0 = arith.constant 0 : index
    %0 = vector.load %arg1[%c0, %c0_0] : memref<16x256xf32, #tpu.memory_space<vmem>>, vector<16x256xf32>
    %1 = arith.truncf %0 : vector<16x256xf32> to vector<16x256xbf16>
    %c0_1 = arith.constant 0 : index
    %c0_2 = arith.constant 0 : index
    %2 = vector.load %arg2[%c0_1, %c0_2] : memref<256x1024xbf16, #tpu.memory_space<vmem>>, vector<256x1024xbf16>
    %cst = arith.constant dense<0.000000e+00> : vector<16x1024xf32>
    %3 = tpu.matmul %1, %2, %cst {dimension_numbers = #tpu.dot_dimension_numbers<[1], [0], [0], [1], [0, 0, 1, 1], [], []>} : vector<16x256xbf16>, vector<256x1024xbf16>, vector<16x1024xf32> -> vector<16x1024xf32>
    %c0_3 = arith.constant 0 : index
    %c0_4 = arith.constant 0 : index
    %4 = vector.load %arg3[%c0_3, %c0_4] : memref<1x1024xf32, #tpu.memory_space<vmem>>, vector<1x1024xf32>
    %5 = vector.broadcast %4 : vector<1x1024xf32> to vector<16x1024xf32>
    %6 = arith.addf %3, %5 : vector<16x1024xf32>
    %cst_5 = arith.constant 0.000000e+00 : f32
    %7 = vector.broadcast %cst_5 : f32 to vector<16x1024xf32>
    %8 = arith.maximumf %6, %7 : vector<16x1024xf32>
    %9 = arith.truncf %8 : vector<16x1024xf32> to vector<16x1024xbf16>
    %c0_6 = arith.constant 0 : index
    %c0_7 = arith.constant 0 : index
    %10 = vector.load %arg4[%c0_6, %c0_7] : memref<1024x256xbf16, #tpu.memory_space<vmem>>, vector<1024x256xbf16>
    %cst_8 = arith.constant dense<0.000000e+00> : vector<16x256xf32>
    %11 = tpu.matmul %9, %10, %cst_8 {dimension_numbers = #tpu.dot_dimension_numbers<[1], [0], [0], [1], [0, 0, 1, 1], [], []>} : vector<16x1024xbf16>, vector<1024x256xbf16>, vector<16x256xf32> -> vector<16x256xf32>
    %c0_9 = arith.constant 0 : index
    %c0_10 = arith.constant 0 : index
    %12 = vector.load %arg5[%c0_9, %c0_10] : memref<1x256xf32, #tpu.memory_space<vmem>>, vector<1x256xf32>
    %13 = vector.broadcast %12 : vector<1x256xf32> to vector<16x256xf32>
    %14 = arith.addf %11, %13 : vector<16x256xf32>
    %c0_11 = arith.constant 0 : index
    %c0_12 = arith.constant 0 : index
    %15 = vector.load %arg6[%c0_11, %c0_12] : memref<16x256xf32, #tpu.memory_space<vmem>>, vector<16x256xf32>
    tpu.vector_store %arg6[%c0_11, %c0_12], %14 {strides = array<i32>} : memref<16x256xf32, #tpu.memory_space<vmem>>, vector<16x256xf32>,
    return
  }
  func.func @transform_0(%arg0: i32) -> (i32, i32) {
    %c0_i32 = arith.constant 0 : i32
    %c0_i32_0 = arith.constant 0 : i32
    return %arg0, %c0_i32 : i32, i32
  }
  func.func @transform_1(%arg0: i32) -> (i32, i32) {
    %c0_i32 = arith.constant 0 : i32
    %c0_i32_0 = arith.constant 0 : i32
    %c0_i32_1 = arith.constant 0 : i32
    return %c0_i32, %c0_i32_0 : i32, i32
  }
  func.func @transform_2(%arg0: i32) -> (i32, i32) {
    %c0_i32 = arith.constant 0 : i32
    %c0_i32_0 = arith.constant 0 : i32
    %c0_i32_1 = arith.constant 0 : i32
    return %c0_i32, %c0_i32_0 : i32, i32
  }
  func.func @transform_3(%arg0: i32) -> (i32, i32) {
    %c0_i32 = arith.constant 0 : i32
    %c0_i32_0 = arith.constant 0 : i32
    %c0_i32_1 = arith.constant 0 : i32
    return %c0_i32, %c0_i32_0 : i32, i32
  }
  func.func @transform_4(%arg0: i32) -> (i32, i32) {
    %c0_i32 = arith.constant 0 : i32
    %c0_i32_0 = arith.constant 0 : i32
    %c0_i32_1 = arith.constant 0 : i32
    return %c0_i32, %c0_i32_0 : i32, i32
  }
  func.func @transform_5(%arg0: i32) -> (i32, i32) {
    %c0_i32 = arith.constant 0 : i32
    %c0_i32_0 = arith.constant 0 : i32
    return %arg0, %c0_i32 : i32, i32
  }
}

</mosaic_0001>

<bundles_post_ra>
// kernel: tpu_custom_call.1
= control target key start
LH: loop header
LB: loop body
LE: loop exit
PB: predicated region body
PF: predicated region fallthrough
CT: control target
= control target key end

     0   :  { %10 = vsyncpa [#allocation3], 0  ;;  %s2733_s0 = inlined_call_operand.hbm [shape: f32[16,256], index: 0, kind: input, shape index: {}]   ;;  %s2734_s1 = inlined_call_operand.hbm [shape: bf16[256,1024], index: 1, kind: input, shape index: {}]   ;;  %s2735_s2 = inlined_call_operand.hbm [shape: f32[1,1024], index: 2, kind: input, shape index: {}]   ;;  %s2736_s3 = inlined_call_operand.hbm [shape: bf16[1024,256], index: 3, kind: input, shape index: {}]   ;;  %s2737_s4 = inlined_call_operand.vmem [shape: f32[1,256], index: 4, kind: input, shape index: {}]   ;;  %s2738_s5 = inlined_call_operand.hbm [shape: f32[16,256], index: 5, kind: output, shape index: {}]  }
   0x1   :  { %11 = vsyncpa [#allocation6], 0 }
   0x2   :  { %12 = vsyncpa [#allocation9], 0 }
   0x3   :  { %13 = vsyncpa [#allocation4], 0  ;;  %s2628_s18 = smov [#allocation5]  }
   0x4   :  { %s31_s19 = sshll.u32 %s2628_s18, 4  ;;  %s32_s19 = int_to_ptr.vmem [resolvable:$true] %s31_s19 }
   0x5   :  { %s2528_s20 = scalar_lea.vmem %s32_s19, 16384  ;;  %p2533_p1 = scmp.lt.s32.totalorder %s32_s19, %s32_s19 }
   0x6   :  { %p2529_p0 = scmp.ne.s32.totalorder %s32_s19, %s2528_s20  ;;  %p2534_p2 = scmp.lt.s32.totalorder %s2528_s20, %s2528_s20 }
   0x8   :  { %p2535_p3 = por %p2534_p2, %p2533_p1 }
   0xa   :  { %p2536_p4 = pnand %p2535_p3, %p2529_p0 }
   0xc   :  { %2539 = shalt.err (!%p2536_p4)
}
   0xd   :  { %s2629_s21 = smov 512   ;;  %s2630_s22 = smov 32  }
   0xe   :  { %37 = dma.hbm_to_vmem [thread:$0]  %s2734_s1, 16384, %s32_s19, [#allocation6], %s2629_s21, %s2629_s21, %s2630_s22  }
   0xf   :  { %s2631_s25 = smov [#allocation2]  }
  0x10   :  { %s19_s26 = sshll.u32 %s2631_s25, 4  ;;  %s20_s26 = int_to_ptr.vmem [resolvable:$true] %s19_s26 }
  0x11   :  { %s2548_s27 = scalar_lea.vmem %s20_s26, 512  ;;  %p2553_p6 = scmp.lt.s32.totalorder %s20_s26, %s20_s26 }
  0x12   :  { %p2549_p5 = scmp.ne.s32.totalorder %s20_s26, %s2548_s27  ;;  %p2554_p7 = scmp.lt.s32.totalorder %s2548_s27, %s2548_s27 }
  0x14   :  { %p2555_p8 = por %p2554_p7, %p2553_p6 }
  0x16   :  { %p2556_p9 = pnand %p2555_p8, %p2549_p5 }
  0x18   :  { %2559 = shalt.err (!%p2556_p9)
}
  0x19   :  { %s2632_s28 = smov 256   ;;  %s2633_s29 = smov 16  }
  0x1a   :  { %25 = dma.hbm_to_vmem [thread:$0]  %s2733_s0, 512, %s20_s26, [#allocation3], %s2632_s28, %s2632_s28, %s2633_s29  }
  0x1b   :  { %s2634_s1 = smov [#allocation7]   ;;  %s2635_s8 = smov [#allocation8]  }
  0x1c   :  { %s44_s7 = sshll.u32 %s2634_s1, 4  ;;  %s53_s9 = sshll.u32 %s2635_s8, 4  ;;  %s45_s7 = int_to_ptr.vmem [resolvable:$true] %s44_s7  ;;  %s54_s9 = int_to_ptr.vmem [resolvable:$true] %s53_s9 }
  0x1d   :  { %s2568_s10 = scalar_lea.vmem %s45_s7, 128  ;;  %p2573_p11 = scmp.lt.s32.totalorder %s45_s7, %s45_s7 }
  0x1e   :  { %p2569_p10 = scmp.ne.s32.totalorder %s45_s7, %s2568_s10  ;;  %p2574_p12 = scmp.lt.s32.totalorder %s2568_s10, %s2568_s10 }
  0x20   :  { %p2575_p13 = por %p2574_p12, %p2573_p11 }
  0x22   :  { %p2576_p0 = pnand %p2575_p13, %p2569_p10 }
  0x24   :  { %2579 = shalt.err (!%p2576_p0)
}
  0x25   :  { %47 = dma.hbm_to_vmem [thread:$0]  %s2735_s2, 128, %s45_s7, [#allocation6]  }
  0x26   :  { %s2588_s13 = scalar_lea.vmem %s54_s9, 16384  ;;  %p2593_p2 = scmp.lt.s32.totalorder %s54_s9, %s54_s9 }
  0x27   :  { %p2589_p1 = scmp.ne.s32.totalorder %s54_s9, %s2588_s13  ;;  %p2594_p3 = scmp.lt.s32.totalorder %s2588_s13, %s2588_s13 }
  0x29   :  { %p2595_p4 = por %p2594_p3, %p2593_p2 }
  0x2b   :  { %p2596_p5 = pnand %p2595_p4, %p2589_p1 }
  0x2d   :  { %2599 = shalt.err (!%p2596_p5)
}
  0x2e   :  { %s2636_s0 = smov 128   ;;  %s2637_s14 = smov 8  }
  0x2f   :  { %59 = dma.hbm_to_vmem [thread:$0]  %s2736_s3, 16384, %s54_s9, [#allocation9], %s2636_s0, %s2636_s0, %s2637_s14  }
  0x30   :  { %2620 = dma.done.wait [#allocation3], 512  }
  0x31   :  { %2621 = vsyncadd [#allocation3], 4294966784 }
  0x32   :  { %2622 = dma.done.wait [#allocation6], 16512  }
  0x33   :  { %2623 = vsyncadd [#allocation6], 4294950784 }
  0x34   :  { %2624 = dma.done.wait [#allocation9], 16384  }
  0x35   :  { %2625 = vsyncadd [#allocation9], 4294950912  ;;  %v136_v0 = vld [vmem:[#allocation5 + $0x1c0] sm:$0xff]  ;;  %v137_v2 = vld [vmem:[#allocation5 + $0x1c8] sm:$0xff] }
  0x36   :  { %v140_v1 = vld [vmem:[#allocation5 + $0x1e0] sm:$0xff]  ;;  %v141_v4 = vld [vmem:[#allocation5 + $0x1e8] sm:$0xff]  ;;  %v77_v54 = vld [vmem:[#allocation2 + $0x18] sm:$0xff] }
  0x37   :  { %v2118_v3 = vcombine.high %v136_v0, %v140_v1  ;;  %v2117_v5 = vcombine.low %v136_v0, %v140_v1  ;;  %v128_v6 = vld [vmem:[#allocation5 + $0x180] sm:$0xff]  ;;  %v2120_v8 = vcombine.high %v137_v2, %v141_v4  ;;  %v2119_v9 = vcombine.low %v137_v2, %v141_v4  ;;  %v129_v11 = vld [vmem:[#allocation5 + $0x188] sm:$0xff] }
  0x38   :  { %v132_v7 = vld [vmem:[#allocation5 + $0x1a0] sm:$0xff]  ;;  %v133_v12 = vld [vmem:[#allocation5 + $0x1a8] sm:$0xff] }
  0x39   :  { %v2110_v10 = vcombine.high %v128_v6, %v132_v7  ;;  %v120_v13 = vld [vmem:[#allocation5 + $0x140] sm:$0xff]  ;;  %890 = vmatprep.subr.bf16.mxu0 %v2118_v3  ;;  %v2112_v14 = vcombine.high %v129_v11, %v133_v12  ;;  %v121_v16 = vld [vmem:[#allocation5 + $0x148] sm:$0xff]  ;;  %933 = vmatprep.subr.bf16.mxu1 %v2120_v8  ;;  %v2109_v18 = vcombine.low %v128_v6, %v132_v7 }
  0x3a   :  { %v124_v15 = vld [vmem:[#allocation5 + $0x160] sm:$0xff]  ;;  %v125_v17 = vld [vmem:[#allocation5 + $0x168] sm:$0xff]  ;;  %891 = vmatpush1.bf16.msra.mxu0 %v2117_v5  ;;  %934 = vmatpush1.bf16.msra.mxu1 %v2119_v9  ;;  %v2111_v19 = vcombine.low %v129_v11, %v133_v12 }
  0x3b   :  { %892 = vmatprep.subr.bf16.mxu0 %v2110_v10  ;;  %v2102_v20 = vcombine.high %v120_v13, %v124_v15  ;;  %935 = vmatprep.subr.bf16.mxu1 %v2112_v14  ;;  %v2104_v21 = vcombine.high %v121_v16, %v125_v17  ;;  %v112_v22 = vld [vmem:[#allocation5 + $0x100] sm:$0xff]  ;;  %v113_v24 = vld [vmem:[#allocation5 + $0x108] sm:$0xff]  ;;  %v2101_v26 = vcombine.low %v120_v13, %v124_v15 }
  0x3c   :  { %v116_v23 = vld [vmem:[#allocation5 + $0x120] sm:$0xff]  ;;  %v117_v25 = vld [vmem:[#allocation5 + $0x128] sm:$0xff]  ;;  %v2103_v27 = vcombine.low %v121_v16, %v125_v17 }
  0x3d   :  { %v2094_v28 = vcombine.high %v112_v22, %v116_v23  ;;  %v2096_v29 = vcombine.high %v113_v24, %v117_v25  ;;  %v104_v30 = vld [vmem:[#allocation5 + $0xc0] sm:$0xff]  ;;  %v105_v32 = vld [vmem:[#allocation5 + $0xc8] sm:$0xff]  ;;  %v2093_v34 = vcombine.low %v112_v22, %v116_v23  ;;  %v2095_v35 = vcombine.low %v113_v24, %v117_v25 }
  0x3e   :  { %893 = vmatpush1.bf16.msra.mxu0 %v2109_v18  ;;  %936 = vmatpush1.bf16.msra.mxu1 %v2111_v19  ;;  %v108_v31 = vld [vmem:[#allocation5 + $0xe0] sm:$0xff]  ;;  %v109_v33 = vld [vmem:[#allocation5 + $0xe8] sm:$0xff] }
  0x3f   :  { %894 = vmatprep.subr.bf16.mxu0 %v2102_v20  ;;  %937 = vmatprep.subr.bf16.mxu1 %v2104_v21  ;;  %v2086_v36 = vcombine.high %v104_v30, %v108_v31  ;;  %v2088_v37 = vcombine.high %v105_v32, %v109_v33  ;;  %v96_v38 = vld [vmem:[#allocation5 + $0x80] sm:$0xff]  ;;  %v97_v40 = vld [vmem:[#allocation5 + $0x88] sm:$0xff]  ;;  %v2085_v42 = vcombine.low %v104_v30, %v108_v31 }
  0x40   :  { %v100_v39 = vld [vmem:[#allocation5 + $0xa0] sm:$0xff]  ;;  %v101_v41 = vld [vmem:[#allocation5 + $0xa8] sm:$0xff]  ;;  %v2087_v43 = vcombine.low %v105_v32, %v109_v33 }
  0x41   :  { %v2078_v44 = vcombine.high %v96_v38, %v100_v39  ;;  %v2080_v45 = vcombine.high %v97_v40, %v101_v41  ;;  %v88_v46 = vld [vmem:[#allocation5 + $0x40] sm:$0xff]  ;;  %v89_v48 = vld [vmem:[#allocation5 + $0x48] sm:$0xff]  ;;  %v2077_v50 = vcombine.low %v96_v38, %v100_v39  ;;  %v2079_v51 = vcombine.low %v97_v40, %v101_v41 }
  0x42   :  { %895 = vmatpush1.bf16.msra.mxu0 %v2101_v26  ;;  %938 = vmatpush1.bf16.msra.mxu1 %v2103_v27  ;;  %v92_v47 = vld [vmem:[#allocation5 + $0x60] sm:$0xff]  ;;  %v93_v49 = vld [vmem:[#allocation5 + $0x68] sm:$0xff] }
  0x43   :  { %896 = vmatprep.subr.bf16.mxu0 %v2094_v28  ;;  %939 = vmatprep.subr.bf16.mxu1 %v2096_v29  ;;  %v2070_v52 = vcombine.high %v88_v46, %v92_v47  ;;  %v75_v53 = vld [vmem:[#allocation2 + $0x8] sm:$0xff]  ;;  %v2072_v55 = vcombine.high %v89_v48, %v93_v49  ;;  %v80_v56 = vld [vmem:[#allocation5] sm:$0xff]  ;;  %v2069_v61 = vcombine.low %v88_v46, %v92_v47 }
  0x44   :  { %v84_v57 = vld [vmem:[#allocation5 + $0x20] sm:$0xff]  ;;  %v2684_v58 = vpack.c.bf16 %v77_v54, %v75_v53  ;;  %v81_v59 = vld [vmem:[#allocation5 + $0x8] sm:$0xff]  ;;  %v2071_v62 = vcombine.low %v89_v48, %v93_v49 }
  0x45   :  { %v85_v60 = vld [vmem:[#allocation5 + $0x28] sm:$0xff]  ;;  %v2062_v63 = vcombine.high %v80_v56, %v84_v57  ;;  %v200_v1 = vld [vmem:[#allocation5 + $0x3c0] sm:$0xff]  ;;  %v2061_v5 = vcombine.low %v80_v56, %v84_v57 }
  0x46   :  { %897 = vmatpush1.bf16.msra.mxu0 %v2093_v34  ;;  %940 = vmatpush1.bf16.msra.mxu1 %v2095_v35  ;;  %v2064_v0 = vcombine.high %v81_v59, %v85_v60  ;;  %v204_v2 = vld [vmem:[#allocation5 + $0x3e0] sm:$0xff]  ;;  %v201_v3 = vld [vmem:[#allocation5 + $0x3c8] sm:$0xff]  ;;  %v2063_v6 = vcombine.low %v81_v59, %v85_v60 }
  0x47   :  { %898 = vmatprep.subr.bf16.mxu0 %v2086_v36  ;;  %941 = vmatprep.subr.bf16.mxu1 %v2088_v37  ;;  %v205_v4 = vld [vmem:[#allocation5 + $0x3e8] sm:$0xff]  ;;  %v2182_v7 = vcombine.high %v200_v1, %v204_v2  ;;  %v192_v9 = vld [vmem:[#allocation5 + $0x380] sm:$0xff]  ;;  %v2181_v13 = vcombine.low %v200_v1, %v204_v2 }
  0x48   :  { %922 = vmatprep.mubr.bf16.mxu0 %v2684_v58  ;;  %965 = vmatprep.mubr.bf16.mxu1 %v2684_v58  ;;  %v2184_v8 = vcombine.high %v201_v3, %v205_v4  ;;  %v196_v10 = vld [vmem:[#allocation5 + $0x3a0] sm:$0xff]  ;;  %v193_v11 = vld [vmem:[#allocation5 + $0x388] sm:$0xff]  ;;  %v2183_v14 = vcombine.low %v201_v3, %v205_v4  ;;  %v138_v3 = vld [vmem:[#allocation5 + $0x1d0] sm:$0xff] }
  0x49   :  { %v197_v12 = vld [vmem:[#allocation5 + $0x3a8] sm:$0xff]  ;;  %v2174_v15 = vcombine.high %v192_v9, %v196_v10  ;;  %v184_v17 = vld [vmem:[#allocation5 + $0x340] sm:$0xff]  ;;  %v2173_v21 = vcombine.low %v192_v9, %v196_v10  ;;  %v142_v4 = vld [vmem:[#allocation5 + $0x1f0] sm:$0xff] }
  0x4a   :  { %899 = vmatpush1.bf16.msra.mxu0 %v2085_v42  ;;  %942 = vmatpush1.bf16.msra.mxu1 %v2087_v43  ;;  %v2176_v16 = vcombine.high %v193_v11, %v197_v12  ;;  %v188_v18 = vld [vmem:[#allocation5 + $0x360] sm:$0xff]  ;;  %v185_v19 = vld [vmem:[#allocation5 + $0x348] sm:$0xff]  ;;  %v2175_v22 = vcombine.low %v193_v11, %v197_v12  ;;  %v2122_v10 = vcombine.high %v138_v3, %v142_v4  ;;  %v130_v12 = vld [vmem:[#allocation5 + $0x190] sm:$0xff] }
  0x4b   :  { %900 = vmatprep.subr.bf16.mxu0 %v2078_v44  ;;  %943 = vmatprep.subr.bf16.mxu1 %v2080_v45  ;;  %v189_v20 = vld [vmem:[#allocation5 + $0x368] sm:$0xff]  ;;  %v2166_v23 = vcombine.high %v184_v17, %v188_v18  ;;  %v176_v25 = vld [vmem:[#allocation5 + $0x300] sm:$0xff]  ;;  %v2165_v29 = vcombine.low %v184_v17, %v188_v18  ;;  %v2121_v17 = vcombine.low %v138_v3, %v142_v4  ;;  %v206_v3 = vld [vmem:[#allocation5 + $0x3f0] sm:$0xff] }
  0x4c   :  { %v2168_v24 = vcombine.high %v185_v19, %v189_v20  ;;  %v180_v26 = vld [vmem:[#allocation5 + $0x320] sm:$0xff]  ;;  %v177_v27 = vld [vmem:[#allocation5 + $0x308] sm:$0xff]  ;;  %v2167_v30 = vcombine.low %v185_v19, %v189_v20 }
  0x4d   :  { %v181_v28 = vld [vmem:[#allocation5 + $0x328] sm:$0xff]  ;;  %v2158_v31 = vcombine.high %v176_v25, %v180_v26  ;;  %v168_v33 = vld [vmem:[#allocation5 + $0x2c0] sm:$0xff]  ;;  %v2157_v37 = vcombine.low %v176_v25, %v180_v26 }
  0x4e   :  { %901 = vmatpush1.bf16.msra.mxu0 %v2077_v50  ;;  %944 = vmatpush1.bf16.msra.mxu1 %v2079_v51  ;;  %v2160_v32 = vcombine.high %v177_v27, %v181_v28  ;;  %v172_v34 = vld [vmem:[#allocation5 + $0x2e0] sm:$0xff]  ;;  %v169_v35 = vld [vmem:[#allocation5 + $0x2c8] sm:$0xff]  ;;  %v2159_v38 = vcombine.low %v177_v27, %v181_v28 }
  0x4f   :  { %902 = vmatprep.subr.bf16.mxu0 %v2070_v52  ;;  %945 = vmatprep.subr.bf16.mxu1 %v2072_v55  ;;  %v173_v36 = vld [vmem:[#allocation5 + $0x2e8] sm:$0xff]  ;;  %v2150_v39 = vcombine.high %v168_v33, %v172_v34  ;;  %v160_v41 = vld [vmem:[#allocation5 + $0x280] sm:$0xff]  ;;  %v2149_v45 = vcombine.low %v168_v33, %v172_v34 }
  0x50   :  { %v2152_v40 = vcombine.high %v169_v35, %v173_v36  ;;  %v164_v42 = vld [vmem:[#allocation5 + $0x2a0] sm:$0xff]  ;;  %v161_v43 = vld [vmem:[#allocation5 + $0x288] sm:$0xff]  ;;  %v2151_v46 = vcombine.low %v169_v35, %v173_v36 }
  0x51   :  { %v165_v44 = vld [vmem:[#allocation5 + $0x2a8] sm:$0xff]  ;;  %v2142_v47 = vcombine.high %v160_v41, %v164_v42  ;;  %v152_v49 = vld [vmem:[#allocation5 + $0x240] sm:$0xff]  ;;  %v2141_v53 = vcombine.low %v160_v41, %v164_v42 }
  0x52   :  { %903 = vmatpush1.bf16.msra.mxu0 %v2069_v61  ;;  %946 = vmatpush1.bf16.msra.mxu1 %v2071_v62  ;;  %v2144_v48 = vcombine.high %v161_v43, %v165_v44  ;;  %v156_v50 = vld [vmem:[#allocation5 + $0x260] sm:$0xff]  ;;  %v153_v51 = vld [vmem:[#allocation5 + $0x248] sm:$0xff]  ;;  %v2143_v54 = vcombine.low %v161_v43, %v165_v44  ;;  %v98_v44 = vld [vmem:[#allocation5 + $0x90] sm:$0xff] }
  0x53   :  { %904 = vmatprep.subr.bf16.mxu0 %v2062_v63  ;;  %947 = vmatprep.subr.bf16.mxu1 %v2064_v0  ;;  %v157_v52 = vld [vmem:[#allocation5 + $0x268] sm:$0xff]  ;;  %v2134_v55 = vcombine.high %v152_v49, %v156_v50  ;;  %v144_v57 = vld [vmem:[#allocation5 + $0x200] sm:$0xff]  ;;  %v2133_v62 = vcombine.low %v152_v49, %v156_v50  ;;  %v90_v49 = vld [vmem:[#allocation5 + $0x50] sm:$0xff] }
  0x54   :  { %v2136_v56 = vcombine.high %v153_v51, %v157_v52  ;;  %v148_v59 = vld [vmem:[#allocation5 + $0x220] sm:$0xff]  ;;  %v145_v60 = vld [vmem:[#allocation5 + $0x208] sm:$0xff]  ;;  %v2135_v63 = vcombine.low %v153_v51, %v157_v52  ;;  %v94_v50 = vld [vmem:[#allocation5 + $0x70] sm:$0xff] }
  0x55   :  { %v149_v61 = vld [vmem:[#allocation5 + $0x228] sm:$0xff]  ;;  %v2126_v0 = vcombine.high %v144_v57, %v148_v59  ;;  %v74_v2 = vld [vmem:[#allocation2] sm:$0xff] }
  0x56   :  { %905 = vmatpush1.bf16.msra.mxu0 %v2061_v5  ;;  %948 = vmatpush1.bf16.msra.mxu1 %v2063_v6  ;;  %v2128_v1 = vcombine.high %v145_v60, %v149_v61  ;;  %v139_v5 = vld [vmem:[#allocation5 + $0x1d8] sm:$0xff]  ;;  %v2127_v9 = vcombine.low %v145_v60, %v149_v61  ;;  %v2074_v61 = vcombine.high %v90_v49, %v94_v50 }
  0x57   :  { %906 = vmatprep.subr.bf16.mxu0 %v2182_v7  ;;  %949 = vmatprep.subr.bf16.mxu1 %v2184_v8  ;;  %v143_v6 = vld [vmem:[#allocation5 + $0x1f8] sm:$0xff]  ;;  %v2125_v7 = vcombine.low %v144_v57, %v148_v59  ;;  %v76_v8 = vld [vmem:[#allocation2 + $0x10] sm:$0xff] }
  0x58   :  { %v2124_v11 = vcombine.high %v139_v5, %v143_v6  ;;  %v2123_v18 = vcombine.low %v139_v5, %v143_v6  ;;  %v82_v57 = vld [vmem:[#allocation5 + $0x10] sm:$0xff]  ;;  %v203_v6 = vld [vmem:[#allocation5 + $0x3d8] sm:$0xff] }
  0x59   :  { %v86_v59 = vld [vmem:[#allocation5 + $0x30] sm:$0xff] }
  0x5a   :  { %907 = vmatpush2.bf16.msra.mxu0 %v2181_v13  ;;  %950 = vmatpush2.bf16.msra.mxu1 %v2183_v14  ;;  %v134_v13 = vld [vmem:[#allocation5 + $0x1b0] sm:$0xff]  ;;  %v2688_v14 = vpack.c.bf16 %v76_v8, %v74_v2  ;;  %v2066_v5 = vcombine.high %v82_v57, %v86_v59 }
  0x5b   :  { %908 = vmatprep.subr.bf16.mxu0 %v2174_v15  ;;  %951 = vmatprep.subr.bf16.mxu1 %v2176_v16  ;;  %v131_v15 = vld [vmem:[#allocation5 + $0x198] sm:$0xff]  ;;  %v2114_v19 = vcombine.high %v130_v12, %v134_v13  ;;  %v2113_v25 = vcombine.low %v130_v12, %v134_v13  ;;  %v202_v2 = vld [vmem:[#allocation5 + $0x3d0] sm:$0xff] }
  0x5c   :  { %v135_v16 = vld [vmem:[#allocation5 + $0x1b8] sm:$0xff]  ;;  %v2186_v13 = vcombine.high %v202_v2, %v206_v3 }
  0x5d   :  { %v2116_v20 = vcombine.high %v131_v15, %v135_v16  ;;  %v2115_v26 = vcombine.low %v131_v15, %v135_v16  ;;  %v195_v15 = vld [vmem:[#allocation5 + $0x398] sm:$0xff] }
  0x5e   :  { %909 = vmatpush2.bf16.msra.mxu0 %v2173_v21  ;;  %952 = vmatpush2.bf16.msra.mxu1 %v2175_v22  ;;  %v122_v21 = vld [vmem:[#allocation5 + $0x150] sm:$0xff]  ;;  %v199_v16 = vld [vmem:[#allocation5 + $0x3b8] sm:$0xff] }
  0x5f   :  { %910 = vmatprep.subr.bf16.mxu0 %v2166_v23  ;;  %953 = vmatprep.subr.bf16.mxu1 %v2168_v24  ;;  %v126_v22 = vld [vmem:[#allocation5 + $0x170] sm:$0xff]  ;;  %v123_v23 = vld [vmem:[#allocation5 + $0x158] sm:$0xff] }
  0x60   :  { %v127_v24 = vld [vmem:[#allocation5 + $0x178] sm:$0xff]  ;;  %v2106_v27 = vcombine.high %v122_v21, %v126_v22  ;;  %v2105_v33 = vcombine.low %v122_v21, %v126_v22 }
  0x61   :  { %v2108_v28 = vcombine.high %v123_v23, %v127_v24  ;;  %v2107_v34 = vcombine.low %v123_v23, %v127_v24  ;;  %v187_v23 = vld [vmem:[#allocation5 + $0x358] sm:$0xff] }
  0x62   :  { %911 = vmatpush2.bf16.msra.mxu0 %v2165_v29  ;;  %954 = vmatpush2.bf16.msra.mxu1 %v2167_v30  ;;  %v114_v29 = vld [vmem:[#allocation5 + $0x110] sm:$0xff]  ;;  %v191_v24 = vld [vmem:[#allocation5 + $0x378] sm:$0xff] }
  0x63   :  { %912 = vmatprep.subr.bf16.mxu0 %v2158_v31  ;;  %955 = vmatprep.subr.bf16.mxu1 %v2160_v32  ;;  %v118_v30 = vld [vmem:[#allocation5 + $0x130] sm:$0xff]  ;;  %v115_v31 = vld [vmem:[#allocation5 + $0x118] sm:$0xff] }
  0x64   :  { %v119_v32 = vld [vmem:[#allocation5 + $0x138] sm:$0xff]  ;;  %v2098_v35 = vcombine.high %v114_v29, %v118_v30  ;;  %v2097_v41 = vcombine.low %v114_v29, %v118_v30  ;;  %v2179_v29 = vcombine.low %v195_v15, %v199_v16 }
  0x65   :  { %v2100_v36 = vcombine.high %v115_v31, %v119_v32  ;;  %v2099_v42 = vcombine.low %v115_v31, %v119_v32  ;;  %v179_v31 = vld [vmem:[#allocation5 + $0x318] sm:$0xff] }
  0x66   :  { %913 = vmatpush2.bf16.msra.mxu0 %v2157_v37  ;;  %956 = vmatpush2.bf16.msra.mxu1 %v2159_v38  ;;  %v106_v37 = vld [vmem:[#allocation5 + $0xd0] sm:$0xff]  ;;  %v183_v32 = vld [vmem:[#allocation5 + $0x338] sm:$0xff] }
  0x67   :  { %914 = vmatprep.subr.bf16.mxu0 %v2150_v39  ;;  %957 = vmatprep.subr.bf16.mxu1 %v2152_v40  ;;  %v110_v38 = vld [vmem:[#allocation5 + $0xf0] sm:$0xff]  ;;  %v107_v39 = vld [vmem:[#allocation5 + $0xd8] sm:$0xff] }
  0x68   :  { %v111_v40 = vld [vmem:[#allocation5 + $0xf8] sm:$0xff]  ;;  %v2090_v43 = vcombine.high %v106_v37, %v110_v38 }
  0x69   :  { %v2091_v51 = vcombine.low %v107_v39, %v111_v40 }
  0x6a   :  { %915 = vmatpush2.bf16.msra.mxu0 %v2149_v45  ;;  %958 = vmatpush2.bf16.msra.mxu1 %v2151_v46  ;;  %v102_v45 = vld [vmem:[#allocation5 + $0xb0] sm:$0xff]  ;;  %v99_v46 = vld [vmem:[#allocation5 + $0x98] sm:$0xff] }
  0x6b   :  { %916 = vmatprep.subr.bf16.mxu0 %v2142_v47  ;;  %959 = vmatprep.subr.bf16.mxu1 %v2144_v48  ;;  %v103_v47 = vld [vmem:[#allocation5 + $0xb8] sm:$0xff]  ;;  %v2089_v48 = vcombine.low %v106_v37, %v110_v38  ;;  %v2082_v52 = vcombine.high %v98_v44, %v102_v45  ;;  %v2164_v37 = vcombine.high %v179_v31, %v183_v32  ;;  %v170_v38 = vld [vmem:[#allocation5 + $0x2d0] sm:$0xff] }
  0x6c   :  { %v2083_v60 = vcombine.low %v99_v46, %v103_v47 }
  0x6e   :  { %917 = vmatpush2.bf16.msra.mxu0 %v2141_v53  ;;  %960 = vmatpush2.bf16.msra.mxu1 %v2143_v54  ;;  %v91_v53 = vld [vmem:[#allocation5 + $0x58] sm:$0xff] }
  0x6f   :  { %918 = vmatprep.subr.bf16.mxu0 %v2134_v55  ;;  %961 = vmatprep.subr.bf16.mxu1 %v2136_v56  ;;  %v95_v54 = vld [vmem:[#allocation5 + $0x78] sm:$0xff]  ;;  %v2084_v55 = vcombine.high %v99_v46, %v103_v47  ;;  %v2081_v56 = vcombine.low %v98_v44, %v102_v45  ;;  %v162_v45 = vld [vmem:[#allocation5 + $0x290] sm:$0xff] }
  0x70   :  { %v2075_v4 = vcombine.low %v91_v53, %v95_v54  ;;  %v166_v46 = vld [vmem:[#allocation5 + $0x2b0] sm:$0xff]  ;;  %v163_v47 = vld [vmem:[#allocation5 + $0x298] sm:$0xff] }
  0x72   :  { %919 = vmatpush2.bf16.msra.mxu0 %v2133_v62  ;;  %962 = vmatpush2.bf16.msra.mxu1 %v2135_v63  ;;  %v83_v62 = vld [vmem:[#allocation5 + $0x18] sm:$0xff] }
  0x73   :  { %920 = vmatprep.subr.bf16.mxu0 %v2126_v0  ;;  %963 = vmatprep.subr.bf16.mxu1 %v2128_v1  ;;  %v87_v63 = vld [vmem:[#allocation5 + $0x38] sm:$0xff]  ;;  %v2076_v0 = vcombine.high %v91_v53, %v95_v54  ;;  %v2073_v1 = vcombine.low %v90_v49, %v94_v50  ;;  %v154_v53 = vld [vmem:[#allocation5 + $0x250] sm:$0xff] }
  0x74   :  { %v2068_v8 = vcombine.high %v83_v62, %v87_v63  ;;  %v2067_v12 = vcombine.low %v83_v62, %v87_v63  ;;  %v158_v54 = vld [vmem:[#allocation5 + $0x270] sm:$0xff] }
  0x75   :  { %v146_v62 = vld [vmem:[#allocation5 + $0x210] sm:$0xff] }
  0x76   :  { %921 = vmatpush2.bf16.msra.mxu0 %v2125_v7  ;;  %964 = vmatpush2.bf16.msra.mxu1 %v2127_v9  ;;  %v207_v7 = vld [vmem:[#allocation5 + $0x3f8] sm:$0xff]  ;;  %v2065_v9 = vcombine.low %v82_v57, %v86_v59  ;;  %v2145_v57 = vcombine.low %v162_v45, %v166_v46  ;;  %v150_v63 = vld [vmem:[#allocation5 + $0x230] sm:$0xff] }
  0x77   :  { %976 = vmatprep.subr.bf16.mxu0 %v2122_v10  ;;  %1019 = vmatprep.subr.bf16.mxu1 %v2124_v11  ;;  %v194_v10 = vld [vmem:[#allocation5 + $0x390] sm:$0xff]  ;;  %v2187_v21 = vcombine.low %v203_v6, %v207_v7 }
  0x78   :  { %v198_v11 = vld [vmem:[#allocation5 + $0x3b0] sm:$0xff] }
  0x79   :  { %923 = vmatmul.mubr.bf16.vlgmr.msra.gmra.mxu0 %v2688_v14  ;;  %966 = vmatmul.mubr.bf16.vlgmr.msra.gmra.mxu1 %v2688_v14  ;;  %v2178_v22 = vcombine.high %v194_v10, %v198_v11 }
  0x7a   :  { %977 = vmatpush1.bf16.msra.mxu0 %v2121_v17  ;;  %1020 = vmatpush1.bf16.msra.mxu1 %v2123_v18  ;;  %v2188_v17 = vcombine.high %v203_v6, %v207_v7  ;;  %v2185_v18 = vcombine.low %v202_v2, %v206_v3  ;;  %v2137_v2 = vcombine.low %v154_v53, %v158_v54 }
  0x7b   :  { %978 = vmatprep.subr.bf16.mxu0 %v2114_v19  ;;  %1021 = vmatprep.subr.bf16.mxu1 %v2116_v20  ;;  %v186_v19 = vld [vmem:[#allocation5 + $0x350] sm:$0xff]  ;;  %v2129_v6 = vcombine.low %v146_v62, %v150_v63 }
  0x7c   :  { %1008 = vmatprep.mubr.bf16.mxu0 %v2684_v58  ;;  %1051 = vmatprep.mubr.bf16.mxu1 %v2684_v58  ;;  %v2092_v58 = vcombine.high %v107_v39, %v111_v40  ;;  %v190_v20 = vld [vmem:[#allocation5 + $0x370] sm:$0xff]  ;;  %v171_v40 = vld [vmem:[#allocation5 + $0x2d8] sm:$0xff] }
  0x7d   :  { %v2170_v30 = vcombine.high %v186_v19, %v190_v20  ;;  %v174_v39 = vld [vmem:[#allocation5 + $0x2f0] sm:$0xff] }
  0x7e   :  { %979 = vmatpush1.bf16.msra.mxu0 %v2113_v25  ;;  %1022 = vmatpush1.bf16.msra.mxu1 %v2115_v26  ;;  %v2180_v25 = vcombine.high %v195_v15, %v199_v16  ;;  %v2177_v26 = vcombine.low %v194_v10, %v198_v11  ;;  %v2154_v44 = vcombine.high %v170_v38, %v174_v39  ;;  %v2328_v10 = vld [vmem:[#allocation8 + $0x70] ss:$8 sps:$4 sm:$0xff]   ;;  %v2334_v15 = vld [vmem:[#allocation8 + $0x60] ss:$8 sps:$4 sm:$0xff]  }
  0x7f   :  { %980 = vmatprep.subr.bf16.mxu0 %v2106_v27  ;;  %1023 = vmatprep.subr.bf16.mxu1 %v2108_v28  ;;  %v178_v27 = vld [vmem:[#allocation5 + $0x310] sm:$0xff]  ;;  %v2153_v49 = vcombine.low %v170_v38, %v174_v39  ;;  %v2331_v11 = vld [vmem:[#allocation8 + $0x170] ss:$8 sps:$4 sm:$0xff]  }
  0x80   :  { %v182_v28 = vld [vmem:[#allocation5 + $0x330] sm:$0xff] }
  0x81   :  { %v2337_v16 = vld [vmem:[#allocation8 + $0x160] ss:$8 sps:$4 sm:$0xff]  }
  0x82   :  { %981 = vmatpush1.bf16.msra.mxu0 %v2105_v33  ;;  %1024 = vmatpush1.bf16.msra.mxu1 %v2107_v34  ;;  %v2172_v33 = vcombine.high %v187_v23, %v191_v24  ;;  %v2169_v34 = vcombine.low %v186_v19, %v190_v20  ;;  %v2340_v19 = vld [vmem:[#allocation8 + $0x50] ss:$8 sps:$4 sm:$0xff]   ;;  %v2370_v38 = vld [vmem:[#allocation8] ss:$8 sps:$4 sm:$0xff]  }
  0x83   :  { %982 = vmatprep.subr.bf16.mxu0 %v2098_v35  ;;  %1025 = vmatprep.subr.bf16.mxu1 %v2100_v36  ;;  %v2171_v35 = vcombine.low %v187_v23, %v191_v24  ;;  %v2162_v36 = vcombine.high %v178_v27, %v182_v28  ;;  %v2343_v20 = vld [vmem:[#allocation8 + $0x150] ss:$8 sps:$4 sm:$0xff]   ;;  %v2346_v23 = vld [vmem:[#allocation8 + $0x40] ss:$8 sps:$4 sm:$0xff]   ;;  %v2354_v24 = vld [vmem:[#allocation8 + $0x34] ss:$8 sps:$4 sm:$0xff]  }
  0x84   :  { %v2373_v39 = vld [vmem:[#allocation8 + $0x100] ss:$8 sps:$4 sm:$0xff]  }
  0x86   :  { %983 = vmatpush1.bf16.msra.mxu0 %v2097_v41  ;;  %1026 = vmatpush1.bf16.msra.mxu1 %v2099_v42  ;;  %v175_v41 = vld [vmem:[#allocation5 + $0x2f8] sm:$0xff]  ;;  %v2161_v42 = vcombine.low %v178_v27, %v182_v28  ;;  %v2360_v28 = vld [vmem:[#allocation8 + $0x24] ss:$8 sps:$4 sm:$0xff]  }
  0x87   :  { %984 = vmatprep.subr.bf16.mxu0 %v2090_v43  ;;  %1027 = vmatprep.subr.bf16.mxu1 %v2092_v58  ;;  %v2163_v43 = vcombine.low %v179_v31, %v183_v32  ;;  %v2156_v58 = vcombine.high %v171_v40, %v175_v41  ;;  %v2155_v50 = vcombine.low %v171_v40, %v175_v41  ;;  %v2355_v27 = vld [vmem:[#allocation8 + $0x130] ss:$8 sps:$4 sm:$0xff]   ;;  %v2361_v31 = vld [vmem:[#allocation8 + $0x120] ss:$8 sps:$4 sm:$0xff]   ;;  %v2366_v32 = vld [vmem:[#allocation8 + $0x14] ss:$8 sps:$4 sm:$0xff]  }
  0x88   :  { %v2378_v40 = vld [vmem:[#allocation8 + $0xf4] ss:$8 sps:$4 sm:$0xff]  }
  0x89   :  { %v2381_v41 = vld [vmem:[#allocation8 + $0x1f4] ss:$8 sps:$4 sm:$0xff]  }
  0x8a   :  { %985 = vmatpush1.bf16.msra.mxu0 %v2089_v48  ;;  %1028 = vmatpush1.bf16.msra.mxu1 %v2091_v51  ;;  %v167_v48 = vld [vmem:[#allocation5 + $0x2b8] sm:$0xff]  ;;  %v2146_v51 = vcombine.high %v162_v45, %v166_v46  ;;  %v2382_v45 = vld [vmem:[#allocation8 + $0xe0] ss:$8 sps:$4 sm:$0xff]  }
  0x8b   :  { %986 = vmatprep.subr.bf16.mxu0 %v2082_v52  ;;  %1029 = vmatprep.subr.bf16.mxu1 %v2084_v55  ;;  %v2148_v52 = vcombine.high %v163_v47, %v167_v48  ;;  %v155_v55 = vld [vmem:[#allocation5 + $0x258] sm:$0xff]  ;;  %v2147_v59 = vcombine.low %v163_v47, %v167_v48  ;;  %v2385_v46 = vld [vmem:[#allocation8 + $0x1e0] ss:$8 sps:$4 sm:$0xff]  }
  0x8c   :  { %v2390_v47 = vld [vmem:[#allocation8 + $0xd4] ss:$8 sps:$4 sm:$0xff]  }
  0x8d   :  { %v2393_v48 = vld [vmem:[#allocation8 + $0x1d4] ss:$8 sps:$4 sm:$0xff]  }
  0x8e   :  { %987 = vmatpush1.bf16.msra.mxu0 %v2081_v56  ;;  %1030 = vmatpush1.bf16.msra.mxu1 %v2083_v60  ;;  %v159_v56 = vld [vmem:[#allocation5 + $0x278] sm:$0xff]  ;;  %v2138_v60 = vcombine.high %v154_v53, %v158_v54  ;;  %v2394_v53 = vld [vmem:[#allocation8 + $0xc0] ss:$8 sps:$4 sm:$0xff]  }
  0x8f   :  { %988 = vmatprep.subr.bf16.mxu0 %v2074_v61  ;;  %1031 = vmatprep.subr.bf16.mxu1 %v2076_v0  ;;  %v2140_v61 = vcombine.high %v155_v55, %v159_v56  ;;  %v147_v0 = vld [vmem:[#allocation5 + $0x218] sm:$0xff]  ;;  %v2139_v3 = vcombine.low %v155_v55, %v159_v56  ;;  %v2397_v54 = vld [vmem:[#allocation8 + $0x1c0] ss:$8 sps:$4 sm:$0xff]  }
  0x90   :  { %v2402_v55 = vld [vmem:[#allocation8 + $0xb4] ss:$8 sps:$4 sm:$0xff]  }
  0x91   :  { %v2405_v56 = vld [vmem:[#allocation8 + $0x1b4] ss:$8 sps:$4 sm:$0xff]  }
  0x92   :  { %989 = vmatpush1.bf16.msra.mxu0 %v2073_v1  ;;  %1032 = vmatpush1.bf16.msra.mxu1 %v2075_v4  ;;  %v151_v1 = vld [vmem:[#allocation5 + $0x238] sm:$0xff]  ;;  %v2130_v4 = vcombine.high %v146_v62, %v150_v63  ;;  %v2406_v62 = vld [vmem:[#allocation8 + $0xa0] ss:$8 sps:$4 sm:$0xff]  }
  0x93   :  { %990 = vmatprep.subr.bf16.mxu0 %v2066_v5  ;;  %1033 = vmatprep.subr.bf16.mxu1 %v2068_v8  ;;  %v2132_v5 = vcombine.high %v147_v0, %v151_v1  ;;  %v2131_v7 = vcombine.low %v147_v0, %v151_v1  ;;  %v2330_v8 = vld [vmem:[#allocation8 + $0x74] ss:$8 sps:$4 sm:$0xff]   ;;  %v2409_v63 = vld [vmem:[#allocation8 + $0x1a0] ss:$8 sps:$4 sm:$0xff]  }
  0x94   :  { %v2414_v0 = vld [vmem:[#allocation8 + $0x94] ss:$8 sps:$4 sm:$0xff]  }
  0x95   :  { %v2417_v1 = vld [vmem:[#allocation8 + $0x194] ss:$8 sps:$4 sm:$0xff]  }
  0x96   :  { %991 = vmatpush1.bf16.msra.mxu0 %v2065_v9  ;;  %1034 = vmatpush1.bf16.msra.mxu1 %v2067_v12  ;;  %v2333_v9 = vld [vmem:[#allocation8 + $0x174] ss:$8 sps:$4 sm:$0xff]   ;;  %v2336_v12 = vld [vmem:[#allocation8 + $0x64] ss:$8 sps:$4 sm:$0xff]  }
  0x97   :  { %992 = vmatprep.subr.bf16.mxu0 %v2186_v13  ;;  %1035 = vmatprep.subr.bf16.mxu1 %v2188_v17  ;;  %v2339_v13 = vld [vmem:[#allocation8 + $0x164] ss:$8 sps:$4 sm:$0xff]   ;;  %v2342_v17 = vld [vmem:[#allocation8 + $0x54] ss:$8 sps:$4 sm:$0xff]  }
  0x9a   :  { %993 = vmatpush2.bf16.msra.mxu0 %v2185_v18  ;;  %1036 = vmatpush2.bf16.msra.mxu1 %v2187_v21  ;;  %v2345_v18 = vld [vmem:[#allocation8 + $0x154] ss:$8 sps:$4 sm:$0xff]   ;;  %v2348_v21 = vld [vmem:[#allocation8 + $0x44] ss:$8 sps:$4 sm:$0xff]  }
  0x9b   :  { %994 = vmatprep.subr.bf16.mxu0 %v2178_v22  ;;  %1037 = vmatprep.subr.bf16.mxu1 %v2180_v25  ;;  %v2351_v22 = vld [vmem:[#allocation8 + $0x144] ss:$8 sps:$4 sm:$0xff]   ;;  %v2357_v25 = vld [vmem:[#allocation8 + $0x134] ss:$8 sps:$4 sm:$0xff]  }
  0x9e   :  { %995 = vmatpush2.bf16.msra.mxu0 %v2177_v26  ;;  %1038 = vmatpush2.bf16.msra.mxu1 %v2179_v29  ;;  %v2352_v26 = vld [vmem:[#allocation8 + $0x30] ss:$8 sps:$4 sm:$0xff]   ;;  %v2363_v29 = vld [vmem:[#allocation8 + $0x124] ss:$8 sps:$4 sm:$0xff]  }
  0x9f   :  { %996 = vmatprep.subr.bf16.mxu0 %v2170_v30  ;;  %1039 = vmatprep.subr.bf16.mxu1 %v2172_v33  ;;  %v2358_v30 = vld [vmem:[#allocation8 + $0x20] ss:$8 sps:$4 sm:$0xff]   ;;  %v2369_v33 = vld [vmem:[#allocation8 + $0x114] ss:$8 sps:$4 sm:$0xff]  }
  0xa2   :  { %997 = vmatpush2.bf16.msra.mxu0 %v2169_v34  ;;  %1040 = vmatpush2.bf16.msra.mxu1 %v2171_v35  ;;  %v2364_v34 = vld [vmem:[#allocation8 + $0x10] ss:$8 sps:$4 sm:$0xff]  }
  0xa3   :  { %998 = vmatprep.subr.bf16.mxu0 %v2162_v36  ;;  %1041 = vmatprep.subr.bf16.mxu1 %v2164_v37  ;;  %v2367_v35 = vld [vmem:[#allocation8 + $0x110] ss:$8 sps:$4 sm:$0xff]   ;;  %v2372_v36 = vld [vmem:[#allocation8 + $0x4] ss:$8 sps:$4 sm:$0xff]  }
  0xa4   :  { %v2375_v37 = vld [vmem:[#allocation8 + $0x104] ss:$8 sps:$4 sm:$0xff]  }
  0xa6   :  { %999 = vmatpush2.bf16.msra.mxu0 %v2161_v42  ;;  %1042 = vmatpush2.bf16.msra.mxu1 %v2163_v43  ;;  %v2376_v42 = vld [vmem:[#allocation8 + $0xf0] ss:$8 sps:$4 sm:$0xff]  }
  0xa7   :  { %1000 = vmatprep.subr.bf16.mxu0 %v2154_v44  ;;  %1043 = vmatprep.subr.bf16.mxu1 %v2156_v58  ;;  %v2379_v43 = vld [vmem:[#allocation8 + $0x1f0] ss:$8 sps:$4 sm:$0xff]   ;;  %v2384_v44 = vld [vmem:[#allocation8 + $0xe4] ss:$8 sps:$4 sm:$0xff]  }
  0xa8   :  { %v2387_v58 = vld [vmem:[#allocation8 + $0x1e4] ss:$8 sps:$4 sm:$0xff]  }
  0xaa   :  { %1001 = vmatpush2.bf16.msra.mxu0 %v2153_v49  ;;  %1044 = vmatpush2.bf16.msra.mxu1 %v2155_v50  ;;  %v2388_v49 = vld [vmem:[#allocation8 + $0xd0] ss:$8 sps:$4 sm:$0xff]  }
  0xab   :  { %1002 = vmatprep.subr.bf16.mxu0 %v2146_v51  ;;  %1045 = vmatprep.subr.bf16.mxu1 %v2148_v52  ;;  %v2391_v50 = vld [vmem:[#allocation8 + $0x1d0] ss:$8 sps:$4 sm:$0xff]   ;;  %v2396_v51 = vld [vmem:[#allocation8 + $0xc4] ss:$8 sps:$4 sm:$0xff]  }
  0xac   :  { %v2399_v52 = vld [vmem:[#allocation8 + $0x1c4] ss:$8 sps:$4 sm:$0xff]  }
  0xae   :  { %1003 = vmatpush2.bf16.msra.mxu0 %v2145_v57  ;;  %1046 = vmatpush2.bf16.msra.mxu1 %v2147_v59  ;;  %v2400_v57 = vld [vmem:[#allocation8 + $0xb0] ss:$8 sps:$4 sm:$0xff]  }
  0xaf   :  { %1004 = vmatprep.subr.bf16.mxu0 %v2138_v60  ;;  %1047 = vmatprep.subr.bf16.mxu1 %v2140_v61  ;;  %v2403_v59 = vld [vmem:[#allocation8 + $0x1b0] ss:$8 sps:$4 sm:$0xff]   ;;  %v2408_v60 = vld [vmem:[#allocation8 + $0xa4] ss:$8 sps:$4 sm:$0xff]  }
  0xb0   :  { %v2411_v61 = vld [vmem:[#allocation8 + $0x1a4] ss:$8 sps:$4 sm:$0xff]  }
  0xb2   :  { %1005 = vmatpush2.bf16.msra.mxu0 %v2137_v2  ;;  %1048 = vmatpush2.bf16.msra.mxu1 %v2139_v3  ;;  %v2412_v2 = vld [vmem:[#allocation8 + $0x90] ss:$8 sps:$4 sm:$0xff]  }
  0xb3   :  { %1006 = vmatprep.subr.bf16.mxu0 %v2130_v4  ;;  %1049 = vmatprep.subr.bf16.mxu1 %v2132_v5  ;;  %v2415_v3 = vld [vmem:[#allocation8 + $0x190] ss:$8 sps:$4 sm:$0xff]   ;;  %v2420_v4 = vld [vmem:[#allocation8 + $0x84] ss:$8 sps:$4 sm:$0xff]  }
  0xb4   :  { %v2423_v5 = vld [vmem:[#allocation8 + $0x184] ss:$8 sps:$4 sm:$0xff]  }
  0xb6   :  { %1007 = vmatpush2.bf16.msra.mxu0 %v2129_v6  ;;  %1050 = vmatpush2.bf16.msra.mxu1 %v2131_v7  ;;  %v2418_v6 = vld [vmem:[#allocation8 + $0x80] ss:$8 sps:$4 sm:$0xff]  }
  0xb7   :  { %1866 = vmatprep.subr.bf16.mxu0 %v2330_v8  ;;  %1909 = vmatprep.subr.bf16.mxu1 %v2333_v9  ;;  %v2421_v7 = vld [vmem:[#allocation8 + $0x180] ss:$8 sps:$4 sm:$0xff]   ;;  %v2426_v8 = vld [vmem:[#allocation8 + $0x274] ss:$8 sps:$4 sm:$0xff]  }
  0xb8   :  { %v2429_v9 = vld [vmem:[#allocation8 + $0x374] ss:$8 sps:$4 sm:$0xff]  }
  0xb9   :  { %1009 = vmatmul.mubr.bf16.vlgmr.msra.gmra.mxu0 %v2688_v14  ;;  %1052 = vmatmul.mubr.bf16.vlgmr.msra.gmra.mxu1 %v2688_v14  ;;  %v2349_v14 = vld [vmem:[#allocation8 + $0x140] ss:$8 sps:$4 sm:$0xff]  }
  0xba   :  { %1867 = vmatpush1.bf16.msra.mxu0 %v2328_v10  ;;  %1910 = vmatpush1.bf16.msra.mxu1 %v2331_v11  ;;  %v210_v10 = vlaneseq }
  0xbb   :  { %1868 = vmatprep.subr.bf16.mxu0 %v2336_v12  ;;  %1911 = vmatprep.subr.bf16.mxu1 %v2339_v13 }
  0xbc   :  { %v2696_v11 = vshrl.u32 %v210_v10, 7  ;;  %v2463_v10 = vld [vmem:[#allocation8 + $0x310] ss:$8 sps:$4 sm:$0xff]  }
  0xbe   :  { %1869 = vmatpush1.bf16.msra.mxu0 %v2334_v15  ;;  %1912 = vmatpush1.bf16.msra.mxu1 %v2337_v16  ;;  %v220_v12 = vsub.s32 2, %v2696_v11  ;;  %v216_v13 = vsub.s32 1, %v2696_v11  ;;  %v2700_v15 = vld [vmem:[#allocation7] sm:$0xff]  ;;  %v212_v16 = vsub.s32 0, %v2696_v11 }
  0xbf   :  { %1870 = vmatprep.subr.bf16.mxu0 %v2342_v17  ;;  %1913 = vmatprep.subr.bf16.mxu1 %v2345_v18  ;;  %v224_v17 = vsub.s32 3, %v2696_v11 }
  0xc2   :  { %1871 = vmatpush1.bf16.msra.mxu0 %v2340_v19  ;;  %1914 = vmatpush1.bf16.msra.mxu1 %v2343_v20  ;;  %v221_v19 = vrot.slane %v2700_v15, %v220_v12  ;;  %v2468_v12 = vld [vmem:[#allocation8 + $0x204] ss:$8 sps:$4 sm:$0xff]  }
  0xc3   :  { %1872 = vmatprep.subr.bf16.mxu0 %v2348_v21  ;;  %1915 = vmatprep.subr.bf16.mxu1 %v2351_v22  ;;  %v217_v21 = vrot.slane %v2700_v15, %v216_v13  ;;  %v213_v22 = vrot.slane %v2700_v15, %v212_v16 }
  0xc6   :  { %1873 = vmatpush1.bf16.msra.mxu0 %v2346_v23  ;;  %1916 = vmatpush1.bf16.msra.mxu1 %v2349_v14  ;;  %v225_v14 = vrot.slane %v2700_v15, %v224_v17  ;;  %v2471_v17 = vld [vmem:[#allocation8 + $0x304] ss:$8 sps:$4 sm:$0xff]  }
  0xc7   :  { %1874 = vmatprep.subr.bf16.mxu0 %v2354_v24  ;;  %1917 = vmatprep.subr.bf16.mxu1 %v2357_v25 }
  0xca   :  { %1875 = vmatpush1.bf16.msra.mxu0 %v2352_v26  ;;  %1918 = vmatpush1.bf16.msra.mxu1 %v2355_v27 }
  0xcb   :  { %1876 = vmatprep.subr.bf16.mxu0 %v2360_v28  ;;  %1919 = vmatprep.subr.bf16.mxu1 %v2363_v29 }
  0xce   :  { %1877 = vmatpush1.bf16.msra.mxu0 %v2358_v30  ;;  %1920 = vmatpush1.bf16.msra.mxu1 %v2361_v31 }
  0xcf   :  { %1878 = vmatprep.subr.bf16.mxu0 %v2366_v32  ;;  %1921 = vmatprep.subr.bf16.mxu1 %v2369_v33 }
  0xd2   :  { %1879 = vmatpush1.bf16.msra.mxu0 %v2364_v34  ;;  %1922 = vmatpush1.bf16.msra.mxu1 %v2367_v35 }
  0xd3   :  { %1880 = vmatprep.subr.bf16.mxu0 %v2372_v36  ;;  %1923 = vmatprep.subr.bf16.mxu1 %v2375_v37 }
  0xd6   :  { %1881 = vmatpush1.bf16.msra.mxu0 %v2370_v38  ;;  %1924 = vmatpush1.bf16.msra.mxu1 %v2373_v39 }
  0xd7   :  { %1882 = vmatprep.subr.bf16.mxu0 %v2378_v40  ;;  %1925 = vmatprep.subr.bf16.mxu1 %v2381_v41 }
  0xda   :  { %1883 = vmatpush2.bf16.msra.mxu0 %v2376_v42  ;;  %1926 = vmatpush2.bf16.msra.mxu1 %v2379_v43 }
  0xdb   :  { %1884 = vmatprep.subr.bf16.mxu0 %v2384_v44  ;;  %1927 = vmatprep.subr.bf16.mxu1 %v2387_v58 }
  0xde   :  { %1885 = vmatpush2.bf16.msra.mxu0 %v2382_v45  ;;  %1928 = vmatpush2.bf16.msra.mxu1 %v2385_v46  ;;  %v2424_v45 = vld [vmem:[#allocation8 + $0x270] ss:$8 sps:$4 sm:$0xff]  }
  0xdf   :  { %1886 = vmatprep.subr.bf16.mxu0 %v2390_v47  ;;  %1929 = vmatprep.subr.bf16.mxu1 %v2393_v48  ;;  %v2427_v48 = vld [vmem:[#allocation8 + $0x370] ss:$8 sps:$4 sm:$0xff]  }
  0xe2   :  { %1887 = vmatpush2.bf16.msra.mxu0 %v2388_v49  ;;  %1930 = vmatpush2.bf16.msra.mxu1 %v2391_v50  ;;  %v2432_v49 = vld [vmem:[#allocation8 + $0x264] ss:$8 sps:$4 sm:$0xff]  }
  0xe3   :  { %1888 = vmatprep.subr.bf16.mxu0 %v2396_v51  ;;  %1931 = vmatprep.subr.bf16.mxu1 %v2399_v52  ;;  %v2435_v51 = vld [vmem:[#allocation8 + $0x364] ss:$8 sps:$4 sm:$0xff]   ;;  %v2430_v52 = vld [vmem:[#allocation8 + $0x260] ss:$8 sps:$4 sm:$0xff]  }
  0xe6   :  { %1889 = vmatpush2.bf16.msra.mxu0 %v2394_v53  ;;  %1932 = vmatpush2.bf16.msra.mxu1 %v2397_v54  ;;  %v2433_v53 = vld [vmem:[#allocation8 + $0x360] ss:$8 sps:$4 sm:$0xff]   ;;  %v2438_v54 = vld [vmem:[#allocation8 + $0x254] ss:$8 sps:$4 sm:$0xff]  }
  0xe7   :  { %1890 = vmatprep.subr.bf16.mxu0 %v2402_v55  ;;  %1933 = vmatprep.subr.bf16.mxu1 %v2405_v56  ;;  %v2441_v55 = vld [vmem:[#allocation8 + $0x354] ss:$8 sps:$4 sm:$0xff]   ;;  %v2436_v56 = vld [vmem:[#allocation8 + $0x250] ss:$8 sps:$4 sm:$0xff]  }
  0xea   :  { %1891 = vmatpush2.bf16.msra.mxu0 %v2400_v57  ;;  %1934 = vmatpush2.bf16.msra.mxu1 %v2403_v59  ;;  %v2439_v57 = vld [vmem:[#allocation8 + $0x350] ss:$8 sps:$4 sm:$0xff]   ;;  %v2444_v59 = vld [vmem:[#allocation8 + $0x244] ss:$8 sps:$4 sm:$0xff]  }
  0xeb   :  { %1892 = vmatprep.subr.bf16.mxu0 %v2408_v60  ;;  %1935 = vmatprep.subr.bf16.mxu1 %v2411_v61  ;;  %v2447_v60 = vld [vmem:[#allocation8 + $0x344] ss:$8 sps:$4 sm:$0xff]   ;;  %v2442_v61 = vld [vmem:[#allocation8 + $0x240] ss:$8 sps:$4 sm:$0xff]  }
  0xee   :  { %1893 = vmatpush2.bf16.msra.mxu0 %v2406_v62  ;;  %1936 = vmatpush2.bf16.msra.mxu1 %v2409_v63  ;;  %v2445_v62 = vld [vmem:[#allocation8 + $0x340] ss:$8 sps:$4 sm:$0xff]   ;;  %v2450_v63 = vld [vmem:[#allocation8 + $0x234] ss:$8 sps:$4 sm:$0xff]  }
  0xef   :  { %1894 = vmatprep.subr.bf16.mxu0 %v2414_v0  ;;  %1937 = vmatprep.subr.bf16.mxu1 %v2417_v1  ;;  %v2453_v0 = vld [vmem:[#allocation8 + $0x334] ss:$8 sps:$4 sm:$0xff]   ;;  %v2448_v1 = vld [vmem:[#allocation8 + $0x230] ss:$8 sps:$4 sm:$0xff]  }
  0xf2   :  { %1895 = vmatpush2.bf16.msra.mxu0 %v2412_v2  ;;  %1938 = vmatpush2.bf16.msra.mxu1 %v2415_v3  ;;  %v2451_v2 = vld [vmem:[#allocation8 + $0x330] ss:$8 sps:$4 sm:$0xff]   ;;  %v2456_v3 = vld [vmem:[#allocation8 + $0x224] ss:$8 sps:$4 sm:$0xff]  }
  0xf3   :  { %1896 = vmatprep.subr.bf16.mxu0 %v2420_v4  ;;  %1939 = vmatprep.subr.bf16.mxu1 %v2423_v5  ;;  %v2459_v4 = vld [vmem:[#allocation8 + $0x324] ss:$8 sps:$4 sm:$0xff]   ;;  %v2454_v5 = vld [vmem:[#allocation8 + $0x220] ss:$8 sps:$4 sm:$0xff]  }
  0xf6   :  { %1897 = vmatpush2.bf16.msra.mxu0 %v2418_v6  ;;  %1940 = vmatpush2.bf16.msra.mxu1 %v2421_v7  ;;  %v2457_v6 = vld [vmem:[#allocation8 + $0x320] ss:$8 sps:$4 sm:$0xff]   ;;  %v2462_v7 = vld [vmem:[#allocation8 + $0x214] ss:$8 sps:$4 sm:$0xff]  }
  0xf7   :  { %1952 = vmatprep.subr.bf16.mxu0 %v2426_v8  ;;  %1995 = vmatprep.subr.bf16.mxu1 %v2429_v9  ;;  %v2465_v8 = vld [vmem:[#allocation8 + $0x314] ss:$8 sps:$4 sm:$0xff]   ;;  %v2460_v9 = vld [vmem:[#allocation8 + $0x210] ss:$8 sps:$4 sm:$0xff]  }
 0x139   :  { %v924_v18 = vpop.f32.mrf.mxu0  ;;  %v967_v20 = vpop.f32.mrf.mxu1 }
 0x13a   :  { %v968_v26 = vadd.f32 %v967_v20, %v221_v19  ;;  %v925_v30 = vadd.f32 %v924_v18, %v213_v22  ;;  %v2466_v18 = vld [vmem:[#allocation8 + $0x200] ss:$8 sps:$4 sm:$0xff]   ;;  %v2474_v20 = vld [vmem:[#allocation8 + $0x2f4] ss:$8 sps:$4 sm:$0xff]  }
 0x13b   :  { %v926_v23 = vpop.f32.mrf.mxu0  ;;  %v969_v24 = vpop.f32.mrf.mxu1 }
 0x13c   :  { %v927_v27 = vadd.f32 %v926_v23, %v217_v21  ;;  %v970_v31 = vadd.f32 %v969_v24, %v225_v14  ;;  %v1064_v38 = vmax.f32 %v968_v26, 0.0  ;;  %v1062_v42 = vmax.f32 %v925_v30, 0.0  ;;  %v2475_v23 = vld [vmem:[#allocation8 + $0x3f0] ss:$8 sps:$4 sm:$0xff]   ;;  %v2483_v24 = vld [vmem:[#allocation8 + $0x3e4] ss:$8 sps:$4 sm:$0xff]  }
 0x13d   :  { %v928_v25 = vpop.f32.mrf.mxu0  ;;  %v971_v29 = vpop.f32.mrf.mxu1  ;;  %v2481_v26 = vld [vmem:[#allocation8 + $0x3e0] ss:$8 sps:$4 sm:$0xff]   ;;  %v2487_v30 = vld [vmem:[#allocation8 + $0x3d0] ss:$8 sps:$4 sm:$0xff]  }
 0x13e   :  { %v929_v28 = vadd.f32 %v928_v25, %v213_v22  ;;  %v972_v32 = vadd.f32 %v971_v29, %v221_v19  ;;  %v1063_v39 = vmax.f32 %v927_v27, 0.0  ;;  %v1065_v43 = vmax.f32 %v970_v31, 0.0  ;;  %v2469_v19 = vld [vmem:[#allocation8 + $0x300] ss:$8 sps:$4 sm:$0xff]   ;;  %v2472_v22 = vld [vmem:[#allocation8 + $0x2f0] ss:$8 sps:$4 sm:$0xff]  }
 0x13f   :  { %v930_v33 = vpop.f32.mrf.mxu0  ;;  %v973_v35 = vpop.f32.mrf.mxu1  ;;  %v2478_v25 = vld [vmem:[#allocation8 + $0x2e0] ss:$8 sps:$4 sm:$0xff]   ;;  %v2486_v27 = vld [vmem:[#allocation8 + $0x2d4] ss:$8 sps:$4 sm:$0xff]   ;;  %v2484_v29 = vld [vmem:[#allocation8 + $0x2d0] ss:$8 sps:$4 sm:$0xff]  }
 0x140   :  { %v931_v34 = vadd.f32 %v930_v33, %v217_v21  ;;  %v1070_v36 = vmax.f32 %v929_v28, 0.0  ;;  %v974_v37 = vadd.f32 %v973_v35, %v225_v14  ;;  %v1072_v40 = vmax.f32 %v972_v32, 0.0  ;;  %v2477_v21 = vld [vmem:[#allocation8 + $0x3f4] ss:$8 sps:$4 sm:$0xff]   ;;  %v2480_v14 = vld [vmem:[#allocation8 + $0x2e4] ss:$8 sps:$4 sm:$0xff]  }
 0x141   :  { %v2489_v28 = vld [vmem:[#allocation8 + $0x3d4] ss:$8 sps:$4 sm:$0xff]   ;;  %v2492_v31 = vld [vmem:[#allocation8 + $0x2c4] ss:$8 sps:$4 sm:$0xff]   ;;  %v2490_v33 = vld [vmem:[#allocation8 + $0x2c0] ss:$8 sps:$4 sm:$0xff]  }
 0x142   :  { %v1071_v41 = vmax.f32 %v931_v34, 0.0  ;;  %v1073_v44 = vmax.f32 %v974_v37, 0.0  ;;  %v1078_v46 = vpack.c.bf16 %v1070_v36, %v1062_v42  ;;  %v1080_v50 = vpack.c.bf16 %v1072_v40, %v1064_v38  ;;  %v2495_v32 = vld [vmem:[#allocation8 + $0x3c4] ss:$8 sps:$4 sm:$0xff]   ;;  %v2493_v34 = vld [vmem:[#allocation8 + $0x3c0] ss:$8 sps:$4 sm:$0xff]  }
 0x143   :  { %v2498_v35 = vld [vmem:[#allocation8 + $0x2b4] ss:$8 sps:$4 sm:$0xff]   ;;  %v2496_v37 = vld [vmem:[#allocation8 + $0x2b0] ss:$8 sps:$4 sm:$0xff]   ;;  %v232_v40 = vsub.s32 5, %v2696_v11  ;;  %v228_v42 = vsub.s32 4, %v2696_v11 }
 0x144   :  { %v1079_v58 = vpack.c.bf16 %v1071_v41, %v1063_v39  ;;  %v1081_v47 = vpack.c.bf16 %v1073_v44, %v1065_v43  ;;  %v2501_v36 = vld [vmem:[#allocation8 + $0x3b4] ss:$8 sps:$4 sm:$0xff]   ;;  %v2499_v38 = vld [vmem:[#allocation8 + $0x3b0] ss:$8 sps:$4 sm:$0xff]   ;;  %v2504_v39 = vld [vmem:[#allocation8 + $0x2a4] ss:$8 sps:$4 sm:$0xff]  }
 0x145   :  { %v2507_v41 = vld [vmem:[#allocation8 + $0x3a4] ss:$8 sps:$4 sm:$0xff]   ;;  %v240_v43 = vsub.s32 7, %v2696_v11  ;;  %v236_v44 = vsub.s32 6, %v2696_v11 }
 0x146   :  { %1898 = vmatprep.mubr.bf16.mxu0 %v1079_v58  ;;  %1941 = vmatprep.mubr.bf16.mxu1 %v1081_v47  ;;  %v2502_v58 = vld [vmem:[#allocation8 + $0x2a0] ss:$8 sps:$4 sm:$0xff]   ;;  %v2510_v47 = vld [vmem:[#allocation8 + $0x294] ss:$8 sps:$4 sm:$0xff]  }
 0x147   :  { %1899 = vmatmul.mubr.bf16.vlgmr.msra.gmra.mxu0 %v1078_v46  ;;  %1942 = vmatmul.mubr.bf16.vlgmr.msra.gmra.mxu1 %v1080_v50  ;;  %v2505_v46 = vld [vmem:[#allocation8 + $0x3a0] ss:$8 sps:$4 sm:$0xff]   ;;  %v2513_v50 = vld [vmem:[#allocation8 + $0x394] ss:$8 sps:$4 sm:$0xff]  }
 0x148   :  { %1953 = vmatpush1.bf16.msra.mxu0 %v2424_v45  ;;  %1996 = vmatpush1.bf16.msra.mxu1 %v2427_v48 }
 0x149   :  { %1954 = vmatprep.subr.bf16.mxu0 %v2432_v49  ;;  %1997 = vmatprep.subr.bf16.mxu1 %v2435_v51  ;;  %v233_v49 = vrot.slane %v2700_v15, %v232_v40  ;;  %v229_v51 = vrot.slane %v2700_v15, %v228_v42 }
 0x14c   :  { %1955 = vmatpush1.bf16.msra.mxu0 %v2430_v52  ;;  %1998 = vmatpush1.bf16.msra.mxu1 %v2433_v53  ;;  %v241_v53 = vrot.slane %v2700_v15, %v240_v43 }
 0x14d   :  { %1956 = vmatprep.subr.bf16.mxu0 %v2438_v54  ;;  %1999 = vmatprep.subr.bf16.mxu1 %v2441_v55  ;;  %v237_v54 = vrot.slane %v2700_v15, %v236_v44 }
 0x150   :  { %1957 = vmatpush1.bf16.msra.mxu0 %v2436_v56  ;;  %2000 = vmatpush1.bf16.msra.mxu1 %v2439_v57  ;;  %v2508_v56 = vld [vmem:[#allocation8 + $0x290] ss:$8 sps:$4 sm:$0xff]  }
 0x151   :  { %1958 = vmatprep.subr.bf16.mxu0 %v2444_v59  ;;  %2001 = vmatprep.subr.bf16.mxu1 %v2447_v60  ;;  %v2511_v59 = vld [vmem:[#allocation8 + $0x390] ss:$8 sps:$4 sm:$0xff]   ;;  %v2516_v60 = vld [vmem:[#allocation8 + $0x284] ss:$8 sps:$4 sm:$0xff]  }
 0x154   :  { %1959 = vmatpush1.bf16.msra.mxu0 %v2442_v61  ;;  %2002 = vmatpush1.bf16.msra.mxu1 %v2445_v62 }
 0x155   :  { %1960 = vmatprep.subr.bf16.mxu0 %v2450_v63  ;;  %2003 = vmatprep.subr.bf16.mxu1 %v2453_v0  ;;  %v2519_v0 = vld [vmem:[#allocation8 + $0x384] ss:$8 sps:$4 sm:$0xff]  }
 0x158   :  { %1961 = vmatpush1.bf16.msra.mxu0 %v2448_v1  ;;  %2004 = vmatpush1.bf16.msra.mxu1 %v2451_v2 }
 0x159   :  { %1962 = vmatprep.subr.bf16.mxu0 %v2456_v3  ;;  %2005 = vmatprep.subr.bf16.mxu1 %v2459_v4 }
 0x15c   :  { %1963 = vmatpush1.bf16.msra.mxu0 %v2454_v5  ;;  %2006 = vmatpush1.bf16.msra.mxu1 %v2457_v6 }
 0x15d   :  { %1964 = vmatprep.subr.bf16.mxu0 %v2462_v7  ;;  %2007 = vmatprep.subr.bf16.mxu1 %v2465_v8  ;;  %v2514_v7 = vld [vmem:[#allocation8 + $0x280] ss:$8 sps:$4 sm:$0xff]  }
 0x160   :  { %1965 = vmatpush1.bf16.msra.mxu0 %v2460_v9  ;;  %2008 = vmatpush1.bf16.msra.mxu1 %v2463_v10  ;;  %v2517_v10 = vld [vmem:[#allocation8 + $0x380] ss:$8 sps:$4 sm:$0xff]  }
 0x161   :  { %1966 = vmatprep.subr.bf16.mxu0 %v2468_v12  ;;  %2009 = vmatprep.subr.bf16.mxu1 %v2471_v17 }
 0x164   :  { %1967 = vmatpush1.bf16.msra.mxu0 %v2466_v18  ;;  %2010 = vmatpush1.bf16.msra.mxu1 %v2469_v19 }
 0x165   :  { %1968 = vmatprep.subr.bf16.mxu0 %v2474_v20  ;;  %2011 = vmatprep.subr.bf16.mxu1 %v2477_v21 }
 0x168   :  { %1969 = vmatpush2.bf16.msra.mxu0 %v2472_v22  ;;  %2012 = vmatpush2.bf16.msra.mxu1 %v2475_v23 }
 0x169   :  { %1970 = vmatprep.subr.bf16.mxu0 %v2480_v14  ;;  %2013 = vmatprep.subr.bf16.mxu1 %v2483_v24 }
 0x16c   :  { %1971 = vmatpush2.bf16.msra.mxu0 %v2478_v25  ;;  %2014 = vmatpush2.bf16.msra.mxu1 %v2481_v26 }
 0x16d   :  { %1972 = vmatprep.subr.bf16.mxu0 %v2486_v27  ;;  %2015 = vmatprep.subr.bf16.mxu1 %v2489_v28  ;;  %v1214_v28 = vld [vmem:[%s2737_s4] sm:$0x3]  ;;  %s2638_s4 = smov [#allocation10]  }
 0x16e   :  { %s2047_s17 = sshll.u32 %s2638_s4, 4  ;;  %s2048_s17 = int_to_ptr.vmem [resolvable:$true] %s2047_s17 }
 0x16f   :  { %s2600_s18 = scalar_lea.vmem %s2048_s17, 512  ;;  %p2605_p7 = scmp.lt.s32.totalorder %s2048_s17, %s2048_s17 }
 0x170   :  { %1973 = vmatpush2.bf16.msra.mxu0 %v2484_v29  ;;  %2016 = vmatpush2.bf16.msra.mxu1 %v2487_v30  ;;  %v1219_v30 = vrot.slane %v1214_v28, %v212_v16  ;;  %p2601_p6 = scmp.ne.s32.totalorder %s2048_s17, %s2600_s18  ;;  %p2606_p8 = scmp.lt.s32.totalorder %s2600_s18, %s2600_s18 }
 0x171   :  { %1974 = vmatprep.subr.bf16.mxu0 %v2492_v31  ;;  %2017 = vmatprep.subr.bf16.mxu1 %v2495_v32  ;;  %v1223_v32 = vrot.slane %v1214_v28, %v216_v13 }
 0x172   :  { %p2607_p9 = por %p2606_p8, %p2605_p7 }
 0x174   :  { %1975 = vmatpush2.bf16.msra.mxu0 %v2490_v33  ;;  %2018 = vmatpush2.bf16.msra.mxu1 %v2493_v34  ;;  %p2608_p10 = pnand %p2607_p9, %p2601_p6 }
 0x175   :  { %1976 = vmatprep.subr.bf16.mxu0 %v2498_v35  ;;  %2019 = vmatprep.subr.bf16.mxu1 %v2501_v36 }
 0x178   :  { %1977 = vmatpush2.bf16.msra.mxu0 %v2496_v37  ;;  %2020 = vmatpush2.bf16.msra.mxu1 %v2499_v38 }
 0x179   :  { %v1010_v45 = vpop.f32.mrf.mxu0  ;;  %1978 = vmatprep.subr.bf16.mxu0 %v2504_v39  ;;  %v1053_v48 = vpop.f32.mrf.mxu1  ;;  %2021 = vmatprep.subr.bf16.mxu1 %v2507_v41 }
 0x17a   :  { %v1011_v1 = vadd.f32 %v1010_v45, %v229_v51  ;;  %v1054_v5 = vadd.f32 %v1053_v48, %v237_v54 }
 0x17b   :  { %v1012_v52 = vpop.f32.mrf.mxu0  ;;  %v1055_v55 = vpop.f32.mrf.mxu1 }
 0x17c   :  { %1979 = vmatpush2.bf16.msra.mxu0 %v2502_v58  ;;  %2022 = vmatpush2.bf16.msra.mxu1 %v2505_v46  ;;  %v1013_v61 = vadd.f32 %v1012_v52, %v233_v49  ;;  %v1056_v2 = vadd.f32 %v1055_v55, %v241_v53  ;;  %v1066_v19 = vmax.f32 %v1011_v1, 0.0  ;;  %v1068_v22 = vmax.f32 %v1054_v5, 0.0 }
 0x17d   :  { %v1014_v57 = vpop.f32.mrf.mxu0  ;;  %1980 = vmatprep.subr.bf16.mxu0 %v2510_v47  ;;  %v1057_v63 = vpop.f32.mrf.mxu1  ;;  %2023 = vmatprep.subr.bf16.mxu1 %v2513_v50 }
 0x17e   :  { %v1015_v62 = vadd.f32 %v1014_v57, %v229_v51  ;;  %v1058_v3 = vadd.f32 %v1057_v63, %v237_v54  ;;  %v1067_v12 = vmax.f32 %v1013_v61, 0.0  ;;  %v1069_v20 = vmax.f32 %v1056_v2, 0.0 }
 0x17f   :  { %v1016_v4 = vpop.f32.mrf.mxu0  ;;  %v1059_v15 = vpop.f32.mrf.mxu1 }
 0x180   :  { %v1017_v6 = vadd.f32 %v1016_v4, %v233_v49  ;;  %1981 = vmatpush2.bf16.msra.mxu0 %v2508_v56  ;;  %v1074_v8 = vmax.f32 %v1015_v62, 0.0  ;;  %v1060_v9 = vadd.f32 %v1059_v15, %v241_v53  ;;  %2024 = vmatpush2.bf16.msra.mxu1 %v2511_v59  ;;  %v1076_v17 = vmax.f32 %v1058_v3, 0.0 }
 0x181   :  { %1982 = vmatprep.subr.bf16.mxu0 %v2516_v60  ;;  %2025 = vmatprep.subr.bf16.mxu1 %v2519_v0 }
 0x182   :  { %v1075_v18 = vmax.f32 %v1017_v6, 0.0  ;;  %v1077_v21 = vmax.f32 %v1060_v9, 0.0  ;;  %v1082_v14 = vpack.c.bf16 %v1074_v8, %v1066_v19  ;;  %v1084_v25 = vpack.c.bf16 %v1076_v17, %v1068_v22 }
 0x184   :  { %v1083_v23 = vpack.c.bf16 %v1075_v18, %v1067_v12  ;;  %1983 = vmatpush2.bf16.msra.mxu0 %v2514_v7  ;;  %v1085_v24 = vpack.c.bf16 %v1077_v21, %v1069_v20  ;;  %2026 = vmatpush2.bf16.msra.mxu1 %v2517_v10 }
 0x186   :  { %1984 = vmatprep.mubr.bf16.mxu0 %v1083_v23  ;;  %2027 = vmatprep.mubr.bf16.mxu1 %v1085_v24 }
 0x187   :  { %1985 = vmatmul.mubr.bf16.vlgmr.msra.gmra.mxu0 %v1082_v14  ;;  %2028 = vmatmul.mubr.bf16.vlgmr.msra.gmra.mxu1 %v1084_v25 }
 0x207   :  { %v1900_v26 = vpop.f32.mrf.mxu0  ;;  %v1943_v27 = vpop.f32.mrf.mxu1 }
 0x208   :  { %v1901_v34 = vadd.f32 %v1900_v26, %v1219_v30 }
 0x209   :  { %v1902_v29 = vpop.f32.mrf.mxu0  ;;  %v1945_v31 = vpop.f32.mrf.mxu1 }
 0x20a   :  { %v1903_v36 = vadd.f32 %v1902_v29, %v1223_v32  ;;  %v1944_v38 = vadd.f32 %v1943_v27, %v1901_v34 }
 0x20b   :  { %v1904_v33 = vpop.f32.mrf.mxu0  ;;  %v1947_v35 = vpop.f32.mrf.mxu1 }
 0x20c   :  { %v1905_v39 = vadd.f32 %v1904_v33, %v1219_v30  ;;  %v1946_v42 = vadd.f32 %v1945_v31, %v1903_v36 }
 0x20d   :  { %v1906_v37 = vpop.f32.mrf.mxu0  ;;  %v1949_v40 = vpop.f32.mrf.mxu1 }
 0x20e   :  { %v1907_v43 = vadd.f32 %v1906_v37, %v1223_v32  ;;  %v1948_v46 = vadd.f32 %v1947_v35, %v1905_v39 }
 0x210   :  { %v1950_v13 = vadd.f32 %v1949_v40, %v1907_v43 }
 0x247   :  { %v1986_v41 = vpop.f32.mrf.mxu0  ;;  %v2029_v58 = vpop.f32.mrf.mxu1 }
 0x248   :  { %v1987_v44 = vadd.f32 %v1986_v41, %v1944_v38 }
 0x249   :  { %v1988_v45 = vpop.f32.mrf.mxu0  ;;  %v2031_v48 = vpop.f32.mrf.mxu1 }
 0x24a   :  { %v2030_v16 = vadd.f32 %v2029_v58, %v1987_v44  ;;  %v1989_v47 = vadd.f32 %v1988_v45, %v1946_v42 }
 0x24b   :  { %v1990_v11 = vpop.f32.mrf.mxu0  ;;  %v2033_v51 = vpop.f32.mrf.mxu1 }
 0x24c   :  { %2038 = vst [vmem:[#allocation10] sm:$0xff] %v2030_v16  ;;  %v2032_v49 = vadd.f32 %v2031_v48, %v1989_v47  ;;  %v1991_v50 = vadd.f32 %v1990_v11, %v1948_v46 }
 0x24d   :  { %v1992_v52 = vpop.f32.mrf.mxu0  ;;  %v2035_v55 = vpop.f32.mrf.mxu1 }
 0x24e   :  { %2039 = vst [vmem:[#allocation10 + $0x8] sm:$0xff] %v2032_v49  ;;  %v2034_v53 = vadd.f32 %v2033_v51, %v1991_v50  ;;  %v1993_v54 = vadd.f32 %v1992_v52, %v1950_v13 }
 0x250   :  { %2040 = vst [vmem:[#allocation10 + $0x10] sm:$0xff] %v2034_v53  ;;  %v2036_v56 = vadd.f32 %v2035_v55, %v1993_v54 }
 0x252   :  { %2041 = vst [vmem:[#allocation10 + $0x18] sm:$0xff] %v2036_v56 }
 0x253   :  { %2611 = shalt.err (!%p2608_p10)
}
 0x254   :  { %2053 = dma.vmem_to_hbm [thread:$0]  %s2048_s17, 512, %s2738_s5, [#allocation4], %s2632_s28, %s2632_s28, %s2633_s29  }
 0x255   :  { %2626 = dma.done.wait [#allocation4], 512  }
 0x256   :  { %2627 = vsyncadd [#allocation4], 4294966784 }
 0x257   :  { %2057 = vsyncpa [#allocation3], 1 }
 0x258   :  { %2058 = vsyncpa [#allocation6], 1 }
 0x259   :  { %2059 = vsyncpa [#allocation9], 1 }
 0x25a   :  { %2060 = vsyncpa [#allocation4], 1 }

</bundles_post_ra>
